<compile_context>
chip_gen: v7x
topology: tpu7x:2x2x1
jax: 0.10.0
libtpu: 0.0.40
codegen_flags: <defaults>
</compile_context>

<pallas_src>
import numpy as np
import jax
import jax.numpy as jnp
from jax import lax
from jax.experimental import pallas as pl
from jax.experimental.pallas import tpu as pltpu


# ----------------------------- config (small) -----------------------------
B = 2          # batch
T = 8          # sequence length (== contextLength)
E = 32         # embeddingDims
H = 4          # numHeads
DH = E // H    # head dim
N = B * T      # folded batch*time rows
EPS = 1e-5

LOG2_T = T.bit_length() - 1      # 3 : T is a power of two -> shift instead of divide
LOG2_DH = DH.bit_length() - 1    # 3 : DH is a power of two
assert (1 << LOG2_T) == T and (1 << LOG2_DH) == DH

# rows of the packed (8, 4E) == (8, 128) parameter-vector slab (exactly one vreg)
ROW_LN1_S, ROW_LN1_B, ROW_LN2_S, ROW_LN2_B = 0, 1, 2, 3
ROW_B_QKV, ROW_B_O, ROW_B_1, ROW_B_2 = 4, 5, 6, 7

# 128-lane tile offsets inside the packed weight slab (shape (4E, 4*128) = (128, 512))
LANE_W_QKV = 0 * 128   # (E,  3E) at rows 0:E
LANE_W_O   = 1 * 128   # (E,   E) at rows 0:E
LANE_W_1   = 2 * 128   # (E,  4E) at rows 0:E
LANE_W_2   = 3 * 128   # (4E,  E) at rows 0:4E
WSLAB_SHAPE = (4 * E, 4 * 128)


# ------------------------------ kernel body -------------------------------
def _layernorm(x, scale, shift):
    mean = jnp.mean(x, axis=-1, keepdims=True)
    c = x - mean
    var = jnp.mean(c * c, axis=-1, keepdims=True)        # biased (torch unbiased=False)
    return scale * (c * lax.rsqrt(var + EPS)) + shift


def _gelu_tanh(x):
    c = jnp.sqrt(jnp.float32(2.0 / jnp.pi))
    return 0.5 * x * (1.0 + jnp.tanh(c * (x + 0.044715 * (x * x * x))))


def transformer_block_kernel(x_ref, vec_ref, wslab_ref, out_ref):
    x = x_ref[...]                                        # (N, E) = (B*T, E)
    vecs = vec_ref[...]                                   # (8, 4E) -- one vreg

    ln1_s = vecs[ROW_LN1_S:ROW_LN1_S + 1, :E]
    ln1_b = vecs[ROW_LN1_B:ROW_LN1_B + 1, :E]
    ln2_s = vecs[ROW_LN2_S:ROW_LN2_S + 1, :E]
    ln2_b = vecs[ROW_LN2_B:ROW_LN2_B + 1, :E]
    b_qkv = vecs[ROW_B_QKV:ROW_B_QKV + 1, :3 * E]
    b_o   = vecs[ROW_B_O:ROW_B_O + 1, :E]
    b_1   = vecs[ROW_B_1:ROW_B_1 + 1, :4 * E]
    b_2   = vecs[ROW_B_2:ROW_B_2 + 1, :E]

    # Static, lane-tile-aligned slices of the packed weight slab (free).
    w_qkv = wslab_ref[0:E,     LANE_W_QKV:LANE_W_QKV + 3 * E]   # (E, 3E)
    w_o   = wslab_ref[0:E,     LANE_W_O:LANE_W_O + E]           # (E, E)
    w_1   = wslab_ref[0:E,     LANE_W_1:LANE_W_1 + 4 * E]       # (E, 4E)
    w_2   = wslab_ref[0:4 * E, LANE_W_2:LANE_W_2 + E]           # (4E, E)

    # ---- norm1 ----
    xn = _layernorm(x, ln1_s, ln1_b)

    # ---- fused QKV projection: one MXU matmul instead of three ----
    qkv = jnp.dot(xn, w_qkv, preferred_element_type=jnp.float32) + b_qkv      # (N, 3E)

    q = qkv[:, 0:E] * jnp.float32(1.0 / np.sqrt(DH))      # fold 1/sqrt(DH) into q once
    k = qkv[:, E:2 * E]
    v = qkv[:, 2 * E:3 * E]

    # Additive mask bias (causal + same-sequence block-diagonal over the folded
    # batch), built ONCE outside the head loop; block test via right-shift.
    row = lax.broadcasted_iota(jnp.int32, (N, N), 0)
    col = lax.broadcasted_iota(jnp.int32, (N, N), 1)
    keep = jnp.logical_and((row >> LOG2_T) == (col >> LOG2_T), row >= col)
    mask_bias = jnp.where(keep, jnp.float32(0.0), jnp.float32(-1e30))         # (N, N)

    # Per-head lane mask: head h owns lanes [h*DH, (h+1)*DH).
    lane = lax.broadcasted_iota(jnp.int32, (N, E), 1)
    head_of_lane = lane >> LOG2_DH

    nt_dims = (((1,), (1,)), ((), ()))                    # q @ k^T without k transpose

    # Accumulate the full-width per-head contexts (VPU adds), then do ONE K=32
    # output-projection matmul against the whole W_o (instead of 4 K=8 matmuls).
    ctx = jnp.zeros((N, E), jnp.float32)
    for h in range(H):                                    # static unroll, H = 4
        keep_h = head_of_lane == h
        qh = jnp.where(keep_h, q, jnp.float32(0.0))       # zero other heads' lanes:
        kh = jnp.where(keep_h, k, jnp.float32(0.0))       #   contraction over E only
        vh = jnp.where(keep_h, v, jnp.float32(0.0))       #   picks up head-h lanes
        s = lax.dot_general(qh, kh, nt_dims, preferred_element_type=jnp.float32)
        s = s + mask_bias
        s = s - jnp.max(s, axis=-1, keepdims=True)        # diagonal always unmasked -> safe
        p = jnp.exp(s)
        p = p * pl.reciprocal(jnp.sum(p, axis=-1, keepdims=True), approx=True)
        ctx = ctx + jnp.dot(p, vh, preferred_element_type=jnp.float32)        # (N, E)

    att = jnp.dot(ctx, w_o, preferred_element_type=jnp.float32) + b_o         # single W_o matmul

    # TODO(synk): dropout (dropShortcut / attention dropout) is identity in eval mode.
    x1 = att + x                                          # residual 1

    # ---- norm2 + feed-forward ----
    x2n = _layernorm(x1, ln2_s, ln2_b)
    h1 = jnp.dot(x2n, w_1, preferred_element_type=jnp.float32) + b_1
    h1 = _gelu_tanh(h1)
    ff = jnp.dot(h1, w_2, preferred_element_type=jnp.float32) + b_2

    out_ref[...] = (ff + x1).astype(out_ref.dtype)        # residual 2


# ------------------------------- wrapper -----------------------------------
def _pack_param_vectors(ln1_s, ln1_b, ln2_s, ln2_b, b_qkv, b_o, b_1, b_2):
    width = 4 * E                                         # 128 lanes -> exactly one vreg
    def row(vec):
        vec = jnp.asarray(vec, jnp.float32).reshape(-1)
        return jnp.pad(vec, (0, width - vec.shape[0]))
    return jnp.stack([row(ln1_s), row(ln1_b), row(ln2_s), row(ln2_b),
                      row(b_qkv), row(b_o), row(b_1), row(b_2)])


def _pack_weight_slab(w_qkv, wo, w1, w2):
    # Each weight lives in its own 128-lane tile -> static, aligned in-kernel slices.
    slab = jnp.zeros(WSLAB_SHAPE, jnp.float32)
    slab = slab.at[0:E,     LANE_W_QKV:LANE_W_QKV + 3 * E].set(w_qkv)
    slab = slab.at[0:E,     LANE_W_O:LANE_W_O + E].set(wo)
    slab = slab.at[0:E,     LANE_W_1:LANE_W_1 + 4 * E].set(w1)
    slab = slab.at[0:4 * E, LANE_W_2:LANE_W_2 + E].set(w2)
    return slab


def transformer_block(x, params):
    (ln1_s, ln1_b, wq, bq, wk, bk, wv, bv, wo, bo,
     ln2_s, ln2_b, w1, b1, w2, b2) = params

    # host-side parameter packing (free: outside the kernel)
    w_qkv = jnp.concatenate([wq, wk, wv], axis=1)                              # (E, 3E)
    b_qkv = jnp.concatenate([jnp.ravel(bq), jnp.ravel(bk), jnp.ravel(bv)])     # (3E,)
    vecs = _pack_param_vectors(ln1_s, ln1_b, ln2_s, ln2_b, b_qkv, bo, b1, b2)  # (8, 128)
    wslab = _pack_weight_slab(w_qkv, wo, w1, w2)                               # (128, 512)

    x2d = x.reshape(N, E)                                 # fold batch into rows

    vmem = pl.BlockSpec(memory_space=pltpu.MemorySpace.VMEM)   # whole array, VMEM resident
    out2d = pl.pallas_call(
        transformer_block_kernel,
        out_shape=jax.ShapeDtypeStruct((N, E), jnp.float32),
        in_specs=[vmem, vmem, vmem],
        out_specs=vmem,
    )(x2d, vecs, wslab)
    return out2d.reshape(B, T, E)


# --------------------------- pure-JAX reference -----------------------------
def reference_block(x, params):
    (ln1_s, ln1_b, wq, bq, wk, bk, wv, bv, wo, bo,
     ln2_s, ln2_b, w1, b1, w2, b2) = params

    def ln(v, s, sh):
        m = v.mean(-1, keepdims=True)
        var = ((v - m) ** 2).mean(-1, keepdims=True)
        return s * (v - m) / jnp.sqrt(var + EPS) + sh

    xn = ln(x, ln1_s, ln1_b)
    q = xn @ wq + bq
    k = xn @ wk + bk
    v = xn @ wv + bv
    q = q.reshape(B, T, H, DH).transpose(0, 2, 1, 3)
    k = k.reshape(B, T, H, DH).transpose(0, 2, 1, 3)
    v = v.reshape(B, T, H, DH).transpose(0, 2, 1, 3)
    s = (q @ k.transpose(0, 1, 3, 2)) / np.sqrt(DH)
    mask = np.tril(np.ones((T, T), dtype=bool))
    s = jnp.where(mask, s, -1e30)
    p = jax.nn.softmax(s, axis=-1)
    ctx = (p @ v).transpose(0, 2, 1, 3).reshape(B, T, E)
    att = ctx @ wo + bo
    x1 = att + x
    x2n = ln(x1, ln2_s, ln2_b)
    c = np.sqrt(2.0 / np.pi)
    h1 = x2n @ w1 + b1
    g = 0.5 * h1 * (1.0 + jnp.tanh(c * (h1 + 0.044715 * h1 ** 3)))
    ff = g @ w2 + b2
    return ff + x1


# ---------------------------------- main ------------------------------------
if __name__ == "__main__":
    key = jax.random.PRNGKey(0)
    keys = jax.random.split(key, 10)

    x = jax.random.normal(keys[0], (B, T, E), dtype=jnp.float32)

    # deterministic parameter init (weights in (in, out) layout, biases (1, out))
    ln1_s = jnp.ones((1, E), jnp.float32)
    ln1_b = jnp.zeros((1, E), jnp.float32)
    ln2_s = jnp.ones((1, E), jnp.float32)
    ln2_b = jnp.zeros((1, E), jnp.float32)

    sc = 0.05
    wq = sc * jax.random.normal(keys[1], (E, E), jnp.float32)
    wk = sc * jax.random.normal(keys[2], (E, E), jnp.float32)
    wv = sc * jax.random.normal(keys[3], (E, E), jnp.float32)
    wo = sc * jax.random.normal(keys[4], (E, E), jnp.float32)
    bq = sc * jax.random.normal(keys[5], (1, E), jnp.float32)
    bk = sc * jax.random.normal(keys[6], (1, E), jnp.float32)
    bv = sc * jax.random.normal(keys[7], (1, E), jnp.float32)
    bo = jnp.zeros((1, E), jnp.float32)
    w1 = sc * jax.random.normal(keys[8], (E, 4 * E), jnp.float32)
    b1 = jnp.zeros((1, 4 * E), jnp.float32)
    w2 = sc * jax.random.normal(keys[9], (4 * E, E), jnp.float32)
    b2 = jnp.zeros((1, E), jnp.float32)

    params = (ln1_s, ln1_b, wq, bq, wk, bk, wv, bv, wo, bo,
              ln2_s, ln2_b, w1, b1, w2, b2)

    out = jax.block_until_ready(transformer_block(x, params))
    ref = jax.block_until_ready(reference_block(x, params))

    # Tolerance slightly looser than pure-f32 because the softmax denominator uses the
    # EUP approximate reciprocal (pl.reciprocal(approx=True)); errors stay ~1e-4 level.
    np.testing.assert_allclose(np.asarray(out), np.asarray(ref), rtol=1e-3, atol=1e-3)

    print("KERNEL_OK")
</pallas_src>

<mosaic_0001>
module attributes {stable_mosaic.version = 11 : i64} {
  func.func @transformer_block_kernel(%arg0: memref<16x32xf32, #tpu.memory_space<vmem>>, %arg1: memref<8x128xf32, #tpu.memory_space<vmem>>, %arg2: memref<128x512xf32, #tpu.memory_space<vmem>>, %arg3: memref<16x32xf32, #tpu.memory_space<vmem>>) attributes {dimension_semantics = [], scalar_prefetch = 0 : i64, scratch_operands = 0 : i64, tpu.core_type = #tpu.core_type<tc>} {
    %c0 = arith.constant 0 : index
    %c0_0 = arith.constant 0 : index
    %0 = vector.load %arg0[%c0, %c0_0] : memref<16x32xf32, #tpu.memory_space<vmem>>, vector<16x32xf32>
    %c0_1 = arith.constant 0 : index
    %c0_2 = arith.constant 0 : index
    %1 = vector.load %arg1[%c0_1, %c0_2] : memref<8x128xf32, #tpu.memory_space<vmem>>, vector<8x128xf32>
    %2 = vector.extract_strided_slice %1 {offsets = [0, 0], sizes = [1, 32], strides = [1, 1]} : vector<8x128xf32> to vector<1x32xf32>
    %3 = vector.extract_strided_slice %1 {offsets = [1, 0], sizes = [1, 32], strides = [1, 1]} : vector<8x128xf32> to vector<1x32xf32>
    %4 = vector.extract_strided_slice %1 {offsets = [2, 0], sizes = [1, 32], strides = [1, 1]} : vector<8x128xf32> to vector<1x32xf32>
    %5 = vector.extract_strided_slice %1 {offsets = [3, 0], sizes = [1, 32], strides = [1, 1]} : vector<8x128xf32> to vector<1x32xf32>
    %6 = vector.extract_strided_slice %1 {offsets = [4, 0], sizes = [1, 96], strides = [1, 1]} : vector<8x128xf32> to vector<1x96xf32>
    %7 = vector.extract_strided_slice %1 {offsets = [5, 0], sizes = [1, 32], strides = [1, 1]} : vector<8x128xf32> to vector<1x32xf32>
    %8 = vector.extract_strided_slice %1 {offsets = [6, 0], sizes = [1, 128], strides = [1, 1]} : vector<8x128xf32> to vector<1x128xf32>
    %9 = vector.extract_strided_slice %1 {offsets = [7, 0], sizes = [1, 32], strides = [1, 1]} : vector<8x128xf32> to vector<1x32xf32>
    %c0_3 = arith.constant 0 : index
    %c0_4 = arith.constant 0 : index
    %10 = vector.load %arg2[%c0_3, %c0_4] : memref<128x512xf32, #tpu.memory_space<vmem>>, vector<32x96xf32>
    %c0_5 = arith.constant 0 : index
    %c128 = arith.constant 128 : index
    %11 = vector.load %arg2[%c0_5, %c128] : memref<128x512xf32, #tpu.memory_space<vmem>>, vector<32x32xf32>
    %c0_6 = arith.constant 0 : index
    %c256 = arith.constant 256 : index
    %12 = vector.load %arg2[%c0_6, %c256] : memref<128x512xf32, #tpu.memory_space<vmem>>, vector<32x128xf32>
    %c0_7 = arith.constant 0 : index
    %c384 = arith.constant 384 : index
    %13 = vector.load %arg2[%c0_7, %c384] : memref<128x512xf32, #tpu.memory_space<vmem>>, vector<128x32xf32>
    %cst = arith.constant dense<0.000000e+00> : vector<16xf32>
    %14 = vector.multi_reduction <add>, %0, %cst [1] : vector<16x32xf32> to vector<16xf32>
    %15 = vector.shape_cast %14 : vector<16xf32> to vector<16x1xf32>
    %cst_8 = arith.constant 3.200000e+01 : f32
    %16 = vector.broadcast %cst_8 : f32 to vector<16x1xf32>
    %17 = arith.divf %15, %16 : vector<16x1xf32>
    %18 = vector.broadcast %17 : vector<16x1xf32> to vector<16x32xf32>
    %19 = arith.subf %0, %18 : vector<16x32xf32>
    %20 = arith.mulf %19, %19 : vector<16x32xf32>
    %cst_9 = arith.constant dense<0.000000e+00> : vector<16xf32>
    %21 = vector.multi_reduction <add>, %20, %cst_9 [1] : vector<16x32xf32> to vector<16xf32>
    %22 = vector.shape_cast %21 : vector<16xf32> to vector<16x1xf32>
    %cst_10 = arith.constant 3.200000e+01 : f32
    %23 = vector.broadcast %cst_10 : f32 to vector<16x1xf32>
    %24 = arith.divf %22, %23 : vector<16x1xf32>
    %cst_11 = arith.constant 9.99999974E-6 : f32
    %25 = vector.broadcast %cst_11 : f32 to vector<16x1xf32>
    %26 = arith.addf %24, %25 : vector<16x1xf32>
    %27 = math.rsqrt %26 : vector<16x1xf32>
    %28 = vector.broadcast %27 : vector<16x1xf32> to vector<16x32xf32>
    %29 = arith.mulf %19, %28 : vector<16x32xf32>
    %30 = vector.broadcast %2 : vector<1x32xf32> to vector<16x32xf32>
    %31 = arith.mulf %30, %29 : vector<16x32xf32>
    %32 = vector.broadcast %3 : vector<1x32xf32> to vector<16x32xf32>
    %33 = arith.addf %31, %32 : vector<16x32xf32>
    %cst_12 = arith.constant dense<0.000000e+00> : vector<16x96xf32>
    %34 = tpu.matmul %33, %10, %cst_12 {dimension_numbers = #tpu.dot_dimension_numbers<[1], [0], [0], [1], [0, 0, 1, 1], [], []>} : vector<16x32xf32>, vector<32x96xf32>, vector<16x96xf32> -> vector<16x96xf32>
    %35 = vector.broadcast %6 : vector<1x96xf32> to vector<16x96xf32>
    %36 = arith.addf %34, %35 : vector<16x96xf32>
    %37 = vector.extract_strided_slice %36 {offsets = [0, 0], sizes = [16, 32], strides = [1, 1]} : vector<16x96xf32> to vector<16x32xf32>
    %cst_13 = arith.constant 0.353553385 : f32
    %38 = vector.broadcast %cst_13 : f32 to vector<16x32xf32>
    %39 = arith.mulf %37, %38 : vector<16x32xf32>
    %40 = vector.extract_strided_slice %36 {offsets = [0, 32], sizes = [16, 32], strides = [1, 1]} : vector<16x96xf32> to vector<16x32xf32>
    %41 = vector.extract_strided_slice %36 {offsets = [0, 64], sizes = [16, 32], strides = [1, 1]} : vector<16x96xf32> to vector<16x32xf32>
    %42 = tpu.iota {dimensions = array<i32: 0>} : vector<16x16xi32>
    %43 = tpu.iota {dimensions = array<i32: 1>} : vector<16x16xi32>
    %c3_i32 = arith.constant 3 : i32
    %44 = vector.broadcast %c3_i32 : i32 to vector<16x16xi32>
    %45 = arith.shrsi %42, %44 : vector<16x16xi32>
    %c3_i32_14 = arith.constant 3 : i32
    %46 = vector.broadcast %c3_i32_14 : i32 to vector<16x16xi32>
    %47 = arith.shrsi %43, %46 : vector<16x16xi32>
    %48 = arith.cmpi eq, %45, %47 : vector<16x16xi32>
    %49 = arith.cmpi sge, %42, %43 : vector<16x16xi32>
    %50 = arith.andi %48, %49 : vector<16x16xi1>
    %cst_15 = arith.constant 0.000000e+00 : f32
    %cst_16 = arith.constant -1.000000e+30 : f32
    %51 = vector.broadcast %cst_15 : f32 to vector<16x16xf32>
    %52 = vector.broadcast %cst_16 : f32 to vector<16x16xf32>
    %53 = arith.select %50, %51, %52 : vector<16x16xi1>, vector<16x16xf32>
    %54 = tpu.iota {dimensions = array<i32: 1>} : vector<16x32xi32>
    %c3_i32_17 = arith.constant 3 : i32
    %55 = vector.broadcast %c3_i32_17 : i32 to vector<16x32xi32>
    %56 = arith.shrsi %54, %55 : vector<16x32xi32>
    %cst_18 = arith.constant 0.000000e+00 : f32
    %57 = vector.broadcast %cst_18 : f32 to vector<16x32xf32>
    %c0_i32 = arith.constant 0 : i32
    %58 = vector.broadcast %c0_i32 : i32 to vector<16x32xi32>
    %59 = arith.cmpi eq, %56, %58 : vector<16x32xi32>
    %cst_19 = arith.constant 0.000000e+00 : f32
    %60 = vector.broadcast %cst_19 : f32 to vector<16x32xf32>
    %61 = arith.select %59, %39, %60 : vector<16x32xi1>, vector<16x32xf32>
    %cst_20 = arith.constant 0.000000e+00 : f32
    %62 = vector.broadcast %cst_20 : f32 to vector<16x32xf32>
    %63 = arith.select %59, %40, %62 : vector<16x32xi1>, vector<16x32xf32>
    %cst_21 = arith.constant 0.000000e+00 : f32
    %64 = vector.broadcast %cst_21 : f32 to vector<16x32xf32>
    %65 = arith.select %59, %41, %64 : vector<16x32xi1>, vector<16x32xf32>
    %cst_22 = arith.constant dense<0.000000e+00> : vector<16x16xf32>
    %66 = tpu.matmul %61, %63, %cst_22 {dimension_numbers = #tpu.dot_dimension_numbers<[1], [1], [0], [0], [0, 0, 1, 0], [], []>} : vector<16x32xf32>, vector<16x32xf32>, vector<16x16xf32> -> vector<16x16xf32>
    %67 = arith.addf %66, %53 : vector<16x16xf32>
    %cst_23 = arith.constant dense<0xFF800000> : vector<16xf32>
    %68 = vector.multi_reduction <maximumf>, %67, %cst_23 [1] : vector<16x16xf32> to vector<16xf32>
    %69 = vector.shape_cast %68 : vector<16xf32> to vector<16x1xf32>
    %70 = vector.broadcast %69 : vector<16x1xf32> to vector<16x16xf32>
    %71 = arith.subf %67, %70 : vector<16x16xf32>
    %72 = math.exp %71 : vector<16x16xf32>
    %cst_24 = arith.constant dense<0.000000e+00> : vector<16xf32>
    %73 = vector.multi_reduction <add>, %72, %cst_24 [1] : vector<16x16xf32> to vector<16xf32>
    %74 = vector.shape_cast %73 : vector<16xf32> to vector<16x1xf32>
    %75 = tpu.reciprocal %74 {approx = true} : vector<16x1xf32> -> vector<16x1xf32>
    %76 = vector.broadcast %75 : vector<16x1xf32> to vector<16x16xf32>
    %77 = arith.mulf %72, %76 : vector<16x16xf32>
    %cst_25 = arith.constant dense<0.000000e+00> : vector<16x32xf32>
    %78 = tpu.matmul %77, %65, %cst_25 {dimension_numbers = #tpu.dot_dimension_numbers<[1], [0], [0], [1], [0, 0, 1, 1], [], []>} : vector<16x16xf32>, vector<16x32xf32>, vector<16x32xf32> -> vector<16x32xf32>
    %79 = arith.addf %57, %78 : vector<16x32xf32>
    %c1_i32 = arith.constant 1 : i32
    %80 = vector.broadcast %c1_i32 : i32 to vector<16x32xi32>
    %81 = arith.cmpi eq, %56, %80 : vector<16x32xi32>
    %cst_26 = arith.constant 0.000000e+00 : f32
    %82 = vector.broadcast %cst_26 : f32 to vector<16x32xf32>
    %83 = arith.select %81, %39, %82 : vector<16x32xi1>, vector<16x32xf32>
    %cst_27 = arith.constant 0.000000e+00 : f32
    %84 = vector.broadcast %cst_27 : f32 to vector<16x32xf32>
    %85 = arith.select %81, %40, %84 : vector<16x32xi1>, vector<16x32xf32>
    %cst_28 = arith.constant 0.000000e+00 : f32
    %86 = vector.broadcast %cst_28 : f32 to vector<16x32xf32>
    %87 = arith.select %81, %41, %86 : vector<16x32xi1>, vector<16x32xf32>
    %cst_29 = arith.constant dense<0.000000e+00> : vector<16x16xf32>
    %88 = tpu.matmul %83, %85, %cst_29 {dimension_numbers = #tpu.dot_dimension_numbers<[1], [1], [0], [0], [0, 0, 1, 0], [], []>} : vector<16x32xf32>, vector<16x32xf32>, vector<16x16xf32> -> vector<16x16xf32>
    %89 = arith.addf %88, %53 : vector<16x16xf32>
    %cst_30 = arith.constant dense<0xFF800000> : vector<16xf32>
    %90 = vector.multi_reduction <maximumf>, %89, %cst_30 [1] : vector<16x16xf32> to vector<16xf32>
    %91 = vector.shape_cast %90 : vector<16xf32> to vector<16x1xf32>
    %92 = vector.broadcast %91 : vector<16x1xf32> to vector<16x16xf32>
    %93 = arith.subf %89, %92 : vector<16x16xf32>
    %94 = math.exp %93 : vector<16x16xf32>
    %cst_31 = arith.constant dense<0.000000e+00> : vector<16xf32>
    %95 = vector.multi_reduction <add>, %94, %cst_31 [1] : vector<16x16xf32> to vector<16xf32>
    %96 = vector.shape_cast %95 : vector<16xf32> to vector<16x1xf32>
    %97 = tpu.reciprocal %96 {approx = true} : vector<16x1xf32> -> vector<16x1xf32>
    %98 = vector.broadcast %97 : vector<16x1xf32> to vector<16x16xf32>
    %99 = arith.mulf %94, %98 : vector<16x16xf32>
    %cst_32 = arith.constant dense<0.000000e+00> : vector<16x32xf32>
    %100 = tpu.matmul %99, %87, %cst_32 {dimension_numbers = #tpu.dot_dimension_numbers<[1], [0], [0], [1], [0, 0, 1, 1], [], []>} : vector<16x16xf32>, vector<16x32xf32>, vector<16x32xf32> -> vector<16x32xf32>
    %101 = arith.addf %79, %100 : vector<16x32xf32>
    %c2_i32 = arith.constant 2 : i32
    %102 = vector.broadcast %c2_i32 : i32 to vector<16x32xi32>
    %103 = arith.cmpi eq, %56, %102 : vector<16x32xi32>
    %cst_33 = arith.constant 0.000000e+00 : f32
    %104 = vector.broadcast %cst_33 : f32 to vector<16x32xf32>
    %105 = arith.select %103, %39, %104 : vector<16x32xi1>, vector<16x32xf32>
    %cst_34 = arith.constant 0.000000e+00 : f32
    %106 = vector.broadcast %cst_34 : f32 to vector<16x32xf32>
    %107 = arith.select %103, %40, %106 : vector<16x32xi1>, vector<16x32xf32>
    %cst_35 = arith.constant 0.000000e+00 : f32
    %108 = vector.broadcast %cst_35 : f32 to vector<16x32xf32>
    %109 = arith.select %103, %41, %108 : vector<16x32xi1>, vector<16x32xf32>
    %cst_36 = arith.constant dense<0.000000e+00> : vector<16x16xf32>
    %110 = tpu.matmul %105, %107, %cst_36 {dimension_numbers = #tpu.dot_dimension_numbers<[1], [1], [0], [0], [0, 0, 1, 0], [], []>} : vector<16x32xf32>, vector<16x32xf32>, vector<16x16xf32> -> vector<16x16xf32>
    %111 = arith.addf %110, %53 : vector<16x16xf32>
    %cst_37 = arith.constant dense<0xFF800000> : vector<16xf32>
    %112 = vector.multi_reduction <maximumf>, %111, %cst_37 [1] : vector<16x16xf32> to vector<16xf32>
    %113 = vector.shape_cast %112 : vector<16xf32> to vector<16x1xf32>
    %114 = vector.broadcast %113 : vector<16x1xf32> to vector<16x16xf32>
    %115 = arith.subf %111, %114 : vector<16x16xf32>
    %116 = math.exp %115 : vector<16x16xf32>
    %cst_38 = arith.constant dense<0.000000e+00> : vector<16xf32>
    %117 = vector.multi_reduction <add>, %116, %cst_38 [1] : vector<16x16xf32> to vector<16xf32>
    %118 = vector.shape_cast %117 : vector<16xf32> to vector<16x1xf32>
    %119 = tpu.reciprocal %118 {approx = true} : vector<16x1xf32> -> vector<16x1xf32>
    %120 = vector.broadcast %119 : vector<16x1xf32> to vector<16x16xf32>
    %121 = arith.mulf %116, %120 : vector<16x16xf32>
    %cst_39 = arith.constant dense<0.000000e+00> : vector<16x32xf32>
    %122 = tpu.matmul %121, %109, %cst_39 {dimension_numbers = #tpu.dot_dimension_numbers<[1], [0], [0], [1], [0, 0, 1, 1], [], []>} : vector<16x16xf32>, vector<16x32xf32>, vector<16x32xf32> -> vector<16x32xf32>
    %123 = arith.addf %101, %122 : vector<16x32xf32>
    %c3_i32_40 = arith.constant 3 : i32
    %124 = vector.broadcast %c3_i32_40 : i32 to vector<16x32xi32>
    %125 = arith.cmpi eq, %56, %124 : vector<16x32xi32>
    %cst_41 = arith.constant 0.000000e+00 : f32
    %126 = vector.broadcast %cst_41 : f32 to vector<16x32xf32>
    %127 = arith.select %125, %39, %126 : vector<16x32xi1>, vector<16x32xf32>
    %cst_42 = arith.constant 0.000000e+00 : f32
    %128 = vector.broadcast %cst_42 : f32 to vector<16x32xf32>
    %129 = arith.select %125, %40, %128 : vector<16x32xi1>, vector<16x32xf32>
    %cst_43 = arith.constant 0.000000e+00 : f32
    %130 = vector.broadcast %cst_43 : f32 to vector<16x32xf32>
    %131 = arith.select %125, %41, %130 : vector<16x32xi1>, vector<16x32xf32>
    %cst_44 = arith.constant dense<0.000000e+00> : vector<16x16xf32>
    %132 = tpu.matmul %127, %129, %cst_44 {dimension_numbers = #tpu.dot_dimension_numbers<[1], [1], [0], [0], [0, 0, 1, 0], [], []>} : vector<16x32xf32>, vector<16x32xf32>, vector<16x16xf32> -> vector<16x16xf32>
    %133 = arith.addf %132, %53 : vector<16x16xf32>
    %cst_45 = arith.constant dense<0xFF800000> : vector<16xf32>
    %134 = vector.multi_reduction <maximumf>, %133, %cst_45 [1] : vector<16x16xf32> to vector<16xf32>
    %135 = vector.shape_cast %134 : vector<16xf32> to vector<16x1xf32>
    %136 = vector.broadcast %135 : vector<16x1xf32> to vector<16x16xf32>
    %137 = arith.subf %133, %136 : vector<16x16xf32>
    %138 = math.exp %137 : vector<16x16xf32>
    %cst_46 = arith.constant dense<0.000000e+00> : vector<16xf32>
    %139 = vector.multi_reduction <add>, %138, %cst_46 [1] : vector<16x16xf32> to vector<16xf32>
    %140 = vector.shape_cast %139 : vector<16xf32> to vector<16x1xf32>
    %141 = tpu.reciprocal %140 {approx = true} : vector<16x1xf32> -> vector<16x1xf32>
    %142 = vector.broadcast %141 : vector<16x1xf32> to vector<16x16xf32>
    %143 = arith.mulf %138, %142 : vector<16x16xf32>
    %cst_47 = arith.constant dense<0.000000e+00> : vector<16x32xf32>
    %144 = tpu.matmul %143, %131, %cst_47 {dimension_numbers = #tpu.dot_dimension_numbers<[1], [0], [0], [1], [0, 0, 1, 1], [], []>} : vector<16x16xf32>, vector<16x32xf32>, vector<16x32xf32> -> vector<16x32xf32>
    %145 = arith.addf %123, %144 : vector<16x32xf32>
    %cst_48 = arith.constant dense<0.000000e+00> : vector<16x32xf32>
    %146 = tpu.matmul %145, %11, %cst_48 {dimension_numbers = #tpu.dot_dimension_numbers<[1], [0], [0], [1], [0, 0, 1, 1], [], []>} : vector<16x32xf32>, vector<32x32xf32>, vector<16x32xf32> -> vector<16x32xf32>
    %147 = vector.broadcast %7 : vector<1x32xf32> to vector<16x32xf32>
    %148 = arith.addf %146, %147 : vector<16x32xf32>
    %149 = arith.addf %148, %0 : vector<16x32xf32>
    %cst_49 = arith.constant dense<0.000000e+00> : vector<16xf32>
    %150 = vector.multi_reduction <add>, %149, %cst_49 [1] : vector<16x32xf32> to vector<16xf32>
    %151 = vector.shape_cast %150 : vector<16xf32> to vector<16x1xf32>
    %cst_50 = arith.constant 3.200000e+01 : f32
    %152 = vector.broadcast %cst_50 : f32 to vector<16x1xf32>
    %153 = arith.divf %151, %152 : vector<16x1xf32>
    %154 = vector.broadcast %153 : vector<16x1xf32> to vector<16x32xf32>
    %155 = arith.subf %149, %154 : vector<16x32xf32>
    %156 = arith.mulf %155, %155 : vector<16x32xf32>
    %cst_51 = arith.constant dense<0.000000e+00> : vector<16xf32>
    %157 = vector.multi_reduction <add>, %156, %cst_51 [1] : vector<16x32xf32> to vector<16xf32>
    %158 = vector.shape_cast %157 : vector<16xf32> to vector<16x1xf32>
    %cst_52 = arith.constant 3.200000e+01 : f32
    %159 = vector.broadcast %cst_52 : f32 to vector<16x1xf32>
    %160 = arith.divf %158, %159 : vector<16x1xf32>
    %cst_53 = arith.constant 9.99999974E-6 : f32
    %161 = vector.broadcast %cst_53 : f32 to vector<16x1xf32>
    %162 = arith.addf %160, %161 : vector<16x1xf32>
    %163 = math.rsqrt %162 : vector<16x1xf32>
    %164 = vector.broadcast %163 : vector<16x1xf32> to vector<16x32xf32>
    %165 = arith.mulf %155, %164 : vector<16x32xf32>
    %166 = vector.broadcast %4 : vector<1x32xf32> to vector<16x32xf32>
    %167 = arith.mulf %166, %165 : vector<16x32xf32>
    %168 = vector.broadcast %5 : vector<1x32xf32> to vector<16x32xf32>
    %169 = arith.addf %167, %168 : vector<16x32xf32>
    %cst_54 = arith.constant dense<0.000000e+00> : vector<16x128xf32>
    %170 = tpu.matmul %169, %12, %cst_54 {dimension_numbers = #tpu.dot_dimension_numbers<[1], [0], [0], [1], [0, 0, 1, 1], [], []>} : vector<16x32xf32>, vector<32x128xf32>, vector<16x128xf32> -> vector<16x128xf32>
    %171 = vector.broadcast %8 : vector<1x128xf32> to vector<16x128xf32>
    %172 = arith.addf %170, %171 : vector<16x128xf32>
    %cst_55 = arith.constant 0.636619746 : f32
    %173 = math.sqrt %cst_55 : f32
    %cst_56 = arith.constant 5.000000e-01 : f32
    %174 = vector.broadcast %cst_56 : f32 to vector<16x128xf32>
    %175 = arith.mulf %174, %172 : vector<16x128xf32>
    %176 = arith.mulf %172, %172 : vector<16x128xf32>
    %177 = arith.mulf %176, %172 : vector<16x128xf32>
    %cst_57 = arith.constant 4.471500e-02 : f32
    %178 = vector.broadcast %cst_57 : f32 to vector<16x128xf32>
    %179 = arith.mulf %178, %177 : vector<16x128xf32>
    %180 = arith.addf %172, %179 : vector<16x128xf32>
    %181 = vector.broadcast %173 : f32 to vector<16x128xf32>
    %182 = arith.mulf %181, %180 : vector<16x128xf32>
    %183 = math.tanh %182 : vector<16x128xf32>
    %cst_58 = arith.constant 1.000000e+00 : f32
    %184 = vector.broadcast %cst_58 : f32 to vector<16x128xf32>
    %185 = arith.addf %184, %183 : vector<16x128xf32>
    %186 = arith.mulf %175, %185 : vector<16x128xf32>
    %cst_59 = arith.constant dense<0.000000e+00> : vector<16x32xf32>
    %187 = tpu.matmul %186, %13, %cst_59 {dimension_numbers = #tpu.dot_dimension_numbers<[1], [0], [0], [1], [0, 0, 1, 1], [], []>} : vector<16x128xf32>, vector<128x32xf32>, vector<16x32xf32> -> vector<16x32xf32>
    %188 = vector.broadcast %9 : vector<1x32xf32> to vector<16x32xf32>
    %189 = arith.addf %187, %188 : vector<16x32xf32>
    %190 = arith.addf %189, %149 : vector<16x32xf32>
    %c0_60 = arith.constant 0 : index
    %c0_61 = arith.constant 0 : index
    %191 = vector.load %arg3[%c0_60, %c0_61] : memref<16x32xf32, #tpu.memory_space<vmem>>, vector<16x32xf32>
    tpu.vector_store %arg3[%c0_60, %c0_61], %190 {strides = array<i32>} : memref<16x32xf32, #tpu.memory_space<vmem>>, vector<16x32xf32>,
    return
  }
}

</mosaic_0001>

<bundles_post_ra>
// kernel: tpu_custom_call.1
= control target key start
LH: loop header
LB: loop body
LE: loop exit
PB: predicated region body
PF: predicated region fallthrough
CT: control target
= control target key end

     0   :  { %8 = vsyncpa [#allocation3], 0  ;;  %s2184_s0 = inlined_call_operand.hbm [shape: f32[16,32], index: 0, kind: input, shape index: {}]   ;;  %s2185_s1 = inlined_call_operand.hbm [shape: f32[8,128], index: 1, kind: input, shape index: {}]   ;;  %s2186_s2 = inlined_call_operand.hbm [shape: f32[128,512], index: 2, kind: input, shape index: {}]   ;;  %s2187_s3 = inlined_call_operand.hbm [shape: f32[16,32], index: 3, kind: output, shape index: {}]  }
   0x1   :  { %9 = vsyncpa [#allocation6], 0 }
   0x2   :  { %10 = vsyncpa [#allocation4], 0  ;;  %s1863_s12 = smov [#allocation5]   ;;  %s1864_s14 = smov [#allocation2]  }
   0x3   :  { %s29_s13 = sshll.u32 %s1863_s12, 4  ;;  %s16_s15 = sshll.u32 %s1864_s14, 4  ;;  %s30_s13 = int_to_ptr.vmem [resolvable:$true] %s29_s13  ;;  %s1894_s15 = int_to_ptr.vmem [resolvable:$true] %s16_s15 }
   0x4   :  { %s1769_s18 = scalar_lea.hbm %s2185_s1, 128 }
   0x5   :  { %p1770_p0 = scmp.ne.s32.totalorder %s2185_s1, %s1769_s18  ;;  %p1773_p1 = scmp.lt.u32.totalorder %s1769_s18, %s2185_s1 }
   0x7   :  { %p1775_p2 = pnand %p1773_p1, %p1770_p0 }
   0x9   :  { %1778 = shalt.err (!%p1775_p2)
}
   0xa   :  { %s1779_s23 = scalar_lea.vmem %s30_s13, 128  ;;  %p1784_p4 = scmp.lt.s32.totalorder %s30_s13, %s30_s13 }
   0xb   :  { %p1780_p3 = scmp.ne.s32.totalorder %s30_s13, %s1779_s23  ;;  %p1785_p5 = scmp.lt.s32.totalorder %s1779_s23, %s1779_s23 }
   0xd   :  { %p1786_p6 = por %p1785_p5, %p1784_p4 }
   0xf   :  { %p1787_p7 = pnand %p1786_p6, %p1780_p3 }
  0x11   :  { %1790 = shalt.err (!%p1787_p7)
}
  0x12   :  { %32 = dma.hbm_to_vmem [thread:$0]  %s2185_s1, 128, %s30_s13, [#allocation6]  }
  0x13   :  { %s1791_s28 = scalar_lea.hbm %s2184_s0, 256 }
  0x14   :  { %p1792_p8 = scmp.ne.s32.totalorder %s2184_s0, %s1791_s28  ;;  %p1795_p9 = scmp.lt.u32.totalorder %s1791_s28, %s2184_s0 }
  0x16   :  { %p1797_p10 = pnand %p1795_p9, %p1792_p8 }
  0x18   :  { %1800 = shalt.err (!%p1797_p10)
}
  0x19   :  { %s1801_s6 = scalar_lea.vmem %s1894_s15, 256  ;;  %p1806_p12 = scmp.lt.s32.totalorder %s1894_s15, %s1894_s15 }
  0x1a   :  { %p1802_p11 = scmp.ne.s32.totalorder %s1894_s15, %s1801_s6  ;;  %p1807_p13 = scmp.lt.s32.totalorder %s1801_s6, %s1801_s6 }
  0x1c   :  { %p1808_p0 = por %p1807_p13, %p1806_p12 }
  0x1e   :  { %p1809_p1 = pnand %p1808_p0, %p1802_p11 }
  0x20   :  { %1812 = shalt.err (!%p1809_p1)
}
  0x21   :  { %s1865_s1 = smov 128   ;;  %s1866_s7 = smov 8  }
  0x22   :  { %22 = dma.hbm_to_vmem [thread:$0]  %s2184_s0, 256, %s1894_s15, [#allocation3], %s1865_s1, %s1865_s1, %s1866_s7  }
  0x23   :  { %s1867_s10 = smov [#allocation7]   ;;  %s1813_s14 = scalar_lea.hbm %s2186_s2, 8192 }
  0x24   :  { %s38_s11 = sshll.u32 %s1867_s10, 4  ;;  %p1814_p2 = scmp.ne.s32.totalorder %s2186_s2, %s1813_s14  ;;  %s39_s11 = int_to_ptr.vmem [resolvable:$true] %s38_s11 }
  0x25   :  { %p1817_p3 = scmp.lt.u32.totalorder %s1813_s14, %s2186_s2 }
  0x27   :  { %p1819_p4 = pnand %p1817_p3, %p1814_p2 }
  0x29   :  { %1822 = shalt.err (!%p1819_p4)
}
  0x2a   :  { %s1823_s20 = scalar_lea.vmem %s39_s11, 8192  ;;  %p1828_p6 = scmp.lt.s32.totalorder %s39_s11, %s39_s11 }
  0x2b   :  { %p1824_p5 = scmp.ne.s32.totalorder %s39_s11, %s1823_s20  ;;  %p1829_p7 = scmp.lt.s32.totalorder %s1823_s20, %s1823_s20 }
  0x2d   :  { %p1830_p8 = por %p1829_p7, %p1828_p6 }
  0x2f   :  { %p1831_p9 = pnand %p1830_p8, %p1824_p5 }
  0x31   :  { %1834 = shalt.err (!%p1831_p9)
}
  0x32   :  { %s1868_s0 = smov 512   ;;  %s1869_s15 = smov 32  }
  0x33   :  { %44 = dma.hbm_to_vmem [thread:$0]  %s2186_s2, 8192, %s39_s11, [#allocation6], %s1868_s0, %s1868_s0, %s1869_s15  }
  0x34   :  { %1857 = dma.done.wait [#allocation3], 256  }
  0x35   :  { %1858 = vsyncadd [#allocation3], 4294967040 }
  0x36   :  { %1859 = dma.done.wait [#allocation6], 8320  }
  0x37   :  { %1860 = vsyncadd [#allocation6], 4294958976  ;;  %vm85_vm0 = vcmask 261120   ;;  %v1940_v0 = vld [vmem:[#allocation2] sm:$0xff]  ;;  %v1942_v1 = vld [vmem:[#allocation2 + $0x8] sm:$0xff]  ;;  %v113_v22 = vlaneseq  ;;  %s1870_s2 = smov 96  }
  0x38   :  { %v86_v2 = vsel %vm85_vm0, %v1940_v0, 0.0  ;;  %v89_v3 = vsel %vm85_vm0, %v1942_v1, 0.0  ;;  %v57_v14 = vld [vmem:[#allocation7] sm:$0xff]  ;;  %v1955_v29 = vld [vmem:[#allocation5] sm:$0xff]  ;;  %vm1984_vm4 = vmpackc.low %vm85_vm0, %vm85_vm0  ;;  %vm336_vm9 = vcmask 130048   ;;  %s1872_s23 = smov 64  }
  0x39   :  { %87 = vadd.xlane.f32.xlu0 %v86_v2  ;;  %v58_v15 = vld [vmem:[#allocation7 + $0x20] sm:$0xff]  ;;  %v1952_v26 = vshrl.u32 %v113_v22, 7  ;;  %v216_v42 = vand.u32 127, %v113_v22  ;;  %s1873_s24 = smov [#allocation8]  }
  0x3a   :  { %v59_v16 = vld [vmem:[#allocation7 + $0x40] sm:$0xff]  ;;  %v1594_v17 = vpack.c.bf16 %v58_v15, %v57_v14  ;;  %s1351_s25 = sshll.u32 %s1873_s24, 4  ;;  %s1352_s25 = int_to_ptr.vmem [resolvable:$true] %s1351_s25 }
  0x3b   :  { %v60_v18 = vld [vmem:[#allocation7 + $0x60] sm:$0xff]  ;;  %v115_v28 = vsub.s32 0, %v1952_v26  ;;  %v121_v30 = vsub.s32 1, %v1952_v26  ;;  %v127_v41 = vsub.s32 4, %v1952_v26  ;;  %v1964_v44 = vshra.s32 %v216_v42, 3  ;;  %s1835_s26 = scalar_lea.vmem %s1352_s25, 256  ;;  %p1840_p11 = scmp.lt.s32.totalorder %s1352_s25, %s1352_s25 }
  0x3c   :  { %v1598_v19 = vpack.c.bf16 %v60_v18, %v59_v16  ;;  %1595 = vmatprep.subr.bf16.mxu0 %v1594_v17  ;;  %vm222_vm7 = vcmp.ge.s32.totalorder %v1952_v26, %v216_v42  ;;  %p1836_p10 = scmp.ne.s32.totalorder %s1352_s25, %s1835_s26  ;;  %p1841_p12 = scmp.lt.s32.totalorder %s1835_s26, %s1835_s26 }
  0x3d   :  { %90 = vadd.xlane.f32.xlu0 %v89_v3  ;;  %1597 = vmatpush3.bf16.msra.mxu0 %v1594_v17  ;;  %v116_v31 = vrot.slane %v1955_v29, %v115_v28  ;;  %v122_v34 = vrot.slane %v1955_v29, %v121_v30  ;;  %v128_v43 = vrot.slane %v1955_v29, %v127_v41  ;;  %vm228_vm1 = vcmp.eq.s32.totalorder %v1964_v44, 0 }
  0x3e   :  { %1599 = vmatprep.subr.bf16.mxu0 %v1598_v19  ;;  %vm359_vm2 = vcmp.eq.s32.totalorder %v1964_v44, 1  ;;  %vm637_vm3 = vcmp.eq.s32.totalorder %v1964_v44, 2  ;;  %vm836_vm5 = vcmp.eq.s32.totalorder %v1964_v44, 3  ;;  %vm1621_vm14 = vmpackc.low %vm228_vm1, %vm228_vm1  ;;  %p1842_p13 = por %p1841_p12, %p1840_p11 }
  0x3f   :  { %vm1615_vm13 = vmpackc.low %vm359_vm2, %vm359_vm2 }
  0x40   :  { %vm2061_vm15 = vmpackc.low %vm637_vm3, %vm637_vm3  ;;  %p1843_p0 = pnand %p1842_p13, %p1836_p10 }
  0x41   :  { %1601 = vmatpush3.bf16.msra.mxu0 %v1598_v19 }
  0xc6   :  { %v88_v4 = vpop.xlane.xlu0 %87 }
  0xc7   :  { %v93_v5 = vmul.f32 0.03125, %v88_v4 }
  0xc9   :  { %v95_v6 = vsub.f32 %v1940_v0, %v93_v5 }
  0xca   :  { %v91_v7 = vpop.xlane.xlu0 %90 }
  0xcb   :  { %v94_v8 = vmul.f32 0.03125, %v91_v7  ;;  %v97_v9 = vmul.f32 %v95_v6, %v95_v6 }
  0xcd   :  { %v96_v10 = vsub.f32 %v1942_v1, %v94_v8  ;;  %v99_v11 = vsel %vm85_vm0, %v97_v9, 0.0 }
  0xce   :  { %100 = vadd.xlane.f32.xlu1 %v99_v11  ;;  %v214_v11 = vadd.s32 8, %v1952_v26 }
  0xcf   :  { %v98_v12 = vmul.f32 %v96_v10, %v96_v10 }
  0xd0   :  { %v218_v15 = vshra.s32 %v214_v11, 3  ;;  %vm223_vm11 = vcmp.ge.s32.totalorder %v214_v11, %v216_v42 }
  0xd1   :  { %v102_v13 = vsel %vm85_vm0, %v98_v12, 0.0  ;;  %v1871_v12 = vmov -1e+30  }
  0xd2   :  { %103 = vadd.xlane.f32.xlu1 %v102_v13  ;;  %vm221_vm10 = vcmp.eq.s32.totalorder %v218_v15, %v1964_v44 }
  0xd3   :  { %vm225_vm12 = vmand %vm221_vm10, %vm223_vm11 }
  0xd4   :  { %v2040_v22 = vsel %vm225_vm12, 0.0, %v1871_v12 }
 0x15b   :  { %v101_v20 = vpop.xlane.xlu1 %100 }
 0x15c   :  { %v105_v21 = vmul.f32 0.03125, %v101_v20 }
 0x15e   :  { %v107_v23 = vadd.f32 1e-05, %v105_v21 }
 0x15f   :  { %v104_v24 = vpop.xlane.xlu1 %103 }
 0x160   :  { %1725 = vrsqrt.f32 %v107_v23  ;;  %v106_v25 = vmul.f32 0.03125, %v104_v24 }
 0x162   :  { %v108_v27 = vadd.f32 1e-05, %v106_v25 }
 0x164   :  { %1727 = vrsqrt.f32 %v108_v27 }
 0x16a   :  { %v1726_v32 = vpop.eup %1725 }
 0x16b   :  { %v111_v33 = vmul.f32 %v1726_v32, %v95_v6 }
 0x16d   :  { %v117_v35 = vmul.f32 %v116_v31, %v111_v33 }
 0x16e   :  { %v1728_v36 = vpop.eup %1727 }
 0x16f   :  { %v112_v37 = vmul.f32 %v1728_v36, %v96_v10  ;;  %v123_v38 = vadd.f32 %v122_v34, %v117_v35  ;;  %v217_v10 = vshra.s32 %v1952_v26, 3 }
 0x171   :  { %v118_v39 = vmul.f32 %v116_v31, %v112_v37  ;;  %1478 = vmatprep.mubr.msk.f32.mxu0 %vm85_vm0, %v123_v38  ;;  %vm220_vm6 = vcmp.eq.s32.totalorder %v217_v10, %v1964_v44 }
 0x172   :  { %vm224_vm8 = vmand %vm220_vm6, %vm222_vm7 }
 0x173   :  { %v124_v40 = vadd.f32 %v122_v34, %v118_v39  ;;  %v2031_v13 = vsel %vm224_vm8, 0.0, %v1871_v12 }
 0x175   :  { %1479 = vmatmul.mubr.msk.f32.vlgmr.msra.gmra.mrb[0].mxu0 %vm85_vm0, %v124_v40 }
 0x248   :  { %v1480_v45 = vpop.f32.mrb[0].mxu0 }
 0x249   :  { %v207_v46 = vadd.f32 %v1480_v45, %v128_v43  ;;  %v201_v47 = vpop.f32.mrb[1].mxu0 }
 0x24a   :  { %v202_v48 = vadd.f32 %v201_v47, %v128_v43 }
 0x24b   :  { %v2011_v6 = vmul.f32 0.35355338, %v207_v46 }
 0x24c   :  { %v1967_v49 = vmul.f32 0.35355338, %v202_v48  ;;  %v1969_v50 = vpack.i.bf16 %v207_v46, %v202_v48 }
 0x24d   :  { %v230_v7 = vsel %vm228_vm1, %v2011_v6, 0.0  ;;  %v361_v9 = vsel %vm359_vm2, %v2011_v6, 0.0 }
 0x24e   :  { %1716 = vrot.lane.b32.xlu0 %v1969_v50, %s1870_s2  ;;  %v229_v51 = vsel %vm228_vm1, %v1967_v49, 0.0  ;;  %v360_v8 = vsel %vm359_vm2, %v1967_v49, 0.0 }
 0x24f   :  { %1485 = vmatprep.mubr.msk.f32.mxu0 %vm85_vm0, %v229_v51 }
 0x2c0   :  { %v1717_v52 = vpop.permute.xlu0 %1716 }
 0x2c1   :  { %v1719_v53 = vunpack.i.h.bf16 %v1717_v52  ;;  %v1718_v54 = vunpack.i.l.bf16 %v1717_v52 }
 0x2c3   :  { %v239_v55 = vsel %vm228_vm1, %v1718_v54, 0.0  ;;  %v240_v56 = vsel %vm228_vm1, %v1719_v53, 0.0  ;;  %v362_v58 = vsel %vm359_vm2, %v1718_v54, 0.0  ;;  %v363_v59 = vsel %vm359_vm2, %v1719_v53, 0.0  ;;  %vm1645_vm1 = vmpackc.low %vm836_vm5, %vm836_vm5 }
 0x2c4   :  { %v1602_v60 = vpack.c.bf16 %v240_v56, %v239_v55  ;;  %v640_v61 = vsel %vm637_vm3, %v1718_v54, 0.0  ;;  %v641_v62 = vsel %vm637_vm3, %v1719_v53, 0.0  ;;  %v839_v2 = vsel %vm836_vm5, %v1718_v54, 0.0 }
 0x2c5   :  { %v1997_v63 = vpack.c.bf16 %v641_v62, %v640_v61  ;;  %v840_v3 = vsel %vm836_vm5, %v1719_v53, 0.0  ;;  %v1608_v4 = vpack.c.bf16 %v363_v59, %v362_v58  ;;  %v638_v53 = vsel %vm637_vm3, %v1967_v49, 0.0 }
 0x2c6   :  { %1604 = vmatprep.subr.msk.bf16.mxu0 %vm1984_vm4, %v1602_v60  ;;  %v2005_v5 = vpack.c.bf16 %v840_v3, %v839_v2  ;;  %v639_v54 = vsel %vm637_vm3, %v2011_v6, 0.0 }
 0x2c7   :  { %1607 = vmatpush3.bf16.xpose.msk.msra.mxu0 %vm1984_vm4, %v1602_v60 }
 0x2c8   :  { %1610 = vmatprep.subr.msk.bf16.mxu0 %vm1984_vm4, %v1608_v4 }
 0x2ce   :  { %1486 = vmatmul.mubr.msk.f32.vlgmr.msra.gmra.mrb[2].mxu0 %vm85_vm0, %v230_v7 }
 0x2cf   :  { %1613 = vmatpush3.bf16.xpose.msk.msra.mxu0 %vm1984_vm4, %v1608_v4  ;;  %1492 = vmatprep.mubr.msk.f32.mxu0 %vm85_vm0, %v360_v8 }
 0x2d6   :  { %1493 = vmatmul.mubr.msk.f32.vlgmr.msra.gmra.mrb[4].mxu0 %vm85_vm0, %v361_v9 }
 0x3a1   :  { %v1487_v14 = vpop.f32.mrb[2].mxu0 }
 0x3a2   :  { %v327_v16 = vpop.f32.mrb[3].mxu0  ;;  %v333_v38 = vadd.f32 %v1487_v14, %v2040_v22 }
 0x3a3   :  { %v2034_v17 = vadd.f32 %v327_v16, %v2031_v13 }
 0x3a4   :  { %v340_v39 = vsel %vm336_vm9, %v333_v38, -inf }
 0x3a5   :  { %v337_v18 = vsel %vm336_vm9, %v2034_v17, -inf }
 0x3a6   :  { %338 = vmax.xlane.f32.xlu0 %v337_v18 }
 0x3a9   :  { %v1494_v19 = vpop.f32.mrb[4].mxu0 }
 0x3aa   :  { %v444_v20 = vpop.f32.mrb[5].mxu0  ;;  %v450_v23 = vadd.f32 %v1494_v19, %v2040_v22 }
 0x3ab   :  { %v445_v21 = vadd.f32 %v444_v20, %v2031_v13 }
 0x3ac   :  { %v456_v25 = vsel %vm336_vm9, %v450_v23, -inf }
 0x3ad   :  { %v453_v24 = vsel %vm336_vm9, %v445_v21, -inf }
 0x3ae   :  { %454 = vmax.xlane.f32.xlu1 %v453_v24 }
 0x3b2   :  { %457 = vmax.xlane.f32.xlu1 %v456_v25 }
 0x433   :  { %v339_v55 = vpop.xlane.xlu0 %338 }
 0x434   :  { %v343_v59 = vsub.f32 %v2034_v17, %v339_v55 }
 0x436   :  { %v345_v61 = vmul.f32 1.442695, %v343_v59 }
 0x43b   :  { %v455_v27 = vpop.xlane.xlu1 %454 }
 0x43c   :  { %v459_v28 = vsub.f32 %v445_v21, %v455_v27 }
 0x43e   :  { %v461_v32 = vmul.f32 1.442695, %v459_v28 }
 0x43f   :  { %v458_v30 = vpop.xlane.xlu1 %457 }
 0x440   :  { %v460_v31 = vsub.f32 %v450_v23, %v458_v30 }
 0x442   :  { %v463_v33 = vmul.f32 1.442695, %v460_v31 }
 0x444   :  { %1729 = vpow2.f32 %v463_v33 }
 0x445   :  { %1731 = vpow2.f32 %v461_v32 }
 0x44e   :  { %v1730_v34 = vpop.eup %1729 }
 0x44f   :  { %v468_v35 = vsel %vm336_vm9, %v1730_v34, 0.0  ;;  %v1732_v36 = vpop.eup %1731 }
 0x450   :  { %469 = vadd.xlane.f32.xlu1 %v468_v35  ;;  %v465_v37 = vsel %vm336_vm9, %v1732_v36, 0.0 }
 0x454   :  { %466 = vadd.xlane.f32.xlu1 %v465_v37 }
 0x465   :  { %1721 = vrot.lane.b32.xlu1 %v1969_v50, %s1872_s23 }
 0x489   :  { %341 = vmax.xlane.f32.xlu1 %v340_v39 }
 0x4dd   :  { %v470_v40 = vpop.xlane.xlu1 %469 }
 0x4de   :  { %1733 = vrcp.f32 %v470_v40  ;;  %v837_v40 = vsel %vm836_vm5, %v1967_v49, 0.0 }
 0x4e1   :  { %v467_v41 = vpop.xlane.xlu1 %466 }
 0x4e2   :  { %1735 = vrcp.f32 %v467_v41  ;;  %v838_v41 = vsel %vm836_vm5, %v2011_v6, 0.0 }
 0x4e3   :  { %1737 = vpow2.f32 %v345_v61 }
 0x4e5   :  { %v1722_v42 = vpop.permute.xlu1 %1721 }
 0x4e6   :  { %v1724_v43 = vunpack.i.h.bf16 %v1722_v42  ;;  %v1723_v45 = vunpack.i.l.bf16 %v1722_v42 }
 0x4e8   :  { %v2056_v46 = vpack.c.bf16 %v1724_v43, %v1723_v45  ;;  %v1734_v48 = vpop.eup %1733 }
 0x4e9   :  { %v474_v52 = vmul.f32 %v1734_v48, %v1730_v34 }
 0x4ea   :  { %1616 = vmatprep.subr.msk.bf16.mxu0 %vm1615_vm13, %v2056_v46  ;;  %1622 = vmatprep.subr.msk.bf16.mxu1 %vm1621_vm14, %v2056_v46 }
 0x4eb   :  { %1619 = vmatpush3.bf16.msk.msra.mxu0 %vm1615_vm13, %v2056_v46  ;;  %1625 = vmatpush3.bf16.msk.msra.mxu1 %vm1621_vm14, %v2056_v46 }
 0x4ec   :  { %v1736_v50 = vpop.eup %1735  ;;  %1628 = vmatprep.subr.msk.bf16.mxu0 %vm1984_vm4, %v1997_v63  ;;  %1634 = vmatprep.subr.msk.bf16.mxu1 %vm2061_vm15, %v2056_v46 }
 0x4ed   :  { %v473_v51 = vmul.f32 %v1736_v50, %v1732_v36  ;;  %v1738_v10 = vpop.eup %1737 }
 0x4ee   :  { %v349_v11 = vsel %vm336_vm9, %v1738_v10, 0.0 }
 0x4ef   :  { %1499 = vmatprep.mubr.msk.f32.mxu0 %vm336_vm9, %v473_v51 }
 0x4f0   :  { %1500 = vmatmul.mubr.msk.f32.vlgmr.msra.gmra.mrb[6].mxu0 %vm336_vm9, %v474_v52 }
 0x4f1   :  { %1513 = vmatprep.mubr.msk.f32.mxu0 %vm85_vm0, %v638_v53  ;;  %v61_v53 = vld [vmem:[#allocation7 + $0x8] sm:$0xff] }
 0x4f4   :  { %1631 = vmatpush3.bf16.xpose.msk.msra.mxu0 %vm1984_vm4, %v1997_v63 }
 0x4fb   :  { %1514 = vmatmul.mubr.msk.f32.vlgmr.msra.gmra.mrb[8].mxu0 %vm85_vm0, %v639_v54  ;;  %v62_v54 = vld [vmem:[#allocation7 + $0x28] sm:$0xff] }
 0x4fc   :  { %v1650_v55 = vpack.c.bf16 %v62_v54, %v61_v53  ;;  %v71_v54 = vld [vmem:[#allocation7 + $0x58] sm:$0xff] }
 0x4fe   :  { %1651 = vmatprep.subr.bf16.mxu0 %v1650_v55 }
 0x4ff   :  { %1653 = vmatpush3.bf16.msra.mxu0 %v1650_v55  ;;  %v72_v55 = vld [vmem:[#allocation7 + $0x78] sm:$0xff] }
 0x516   :  { %v342_v60 = vpop.xlane.xlu1 %341 }
 0x517   :  { %v344_v62 = vsub.f32 %v333_v38, %v342_v60 }
 0x519   :  { %v347_v2 = vmul.f32 1.442695, %v344_v62 }
 0x51b   :  { %1739 = vpow2.f32 %v347_v2 }
 0x525   :  { %v1740_v12 = vpop.eup %1739 }
 0x526   :  { %v352_v14 = vsel %vm336_vm9, %v1740_v12, 0.0 }
 0x5c3   :  { %v2088_v56 = vpop.f32.mrb[6].mxu0 }
 0x5c4   :  { %v2090_v58 = vpop.f32.mrb[7].mxu0 }
 0x5ce   :  { %v1515_v3 = vpop.f32.mrb[8].mxu0 }
 0x5cf   :  { %v722_v63 = vpop.f32.mrb[9].mxu0  ;;  %v728_v7 = vadd.f32 %v1515_v3, %v2040_v22 }
 0x5d0   :  { %v723_v4 = vadd.f32 %v722_v63, %v2031_v13  ;;  %v63_v63 = vld [vmem:[#allocation7 + $0x48] sm:$0xff] }
 0x5d1   :  { %v734_v9 = vsel %vm336_vm9, %v728_v7, -inf }
 0x5d2   :  { %v731_v8 = vsel %vm336_vm9, %v723_v4, -inf }
 0x5d3   :  { %732 = vmax.xlane.f32.xlu0 %v731_v8 }
 0x5d7   :  { %735 = vmax.xlane.f32.xlu0 %v734_v9 }
 0x5db   :  { %350 = vadd.xlane.f32.xlu0 %v349_v11 }
 0x5df   :  { %353 = vadd.xlane.f32.xlu0 %v352_v14 }
 0x660   :  { %v733_v15 = vpop.xlane.xlu0 %732 }
 0x661   :  { %v737_v16 = vsub.f32 %v723_v4, %v733_v15  ;;  %v64_v4 = vld [vmem:[#allocation7 + $0x68] sm:$0xff] }
 0x663   :  { %v739_v17 = vmul.f32 1.442695, %v737_v16 }
 0x664   :  { %v736_v18 = vpop.xlane.xlu0 %735 }
 0x665   :  { %1741 = vpow2.f32 %v739_v17  ;;  %v738_v19 = vsub.f32 %v728_v7, %v736_v18  ;;  %v1654_v7 = vpack.c.bf16 %v64_v4, %v63_v63  ;;  %v77_v4 = vld [vmem:[#allocation7 + $0x118] sm:$0xff] }
 0x667   :  { %v741_v20 = vmul.f32 1.442695, %v738_v19  ;;  %1655 = vmatprep.subr.bf16.mxu0 %v1654_v7 }
 0x668   :  { %v351_v21 = vpop.xlane.xlu0 %350  ;;  %1657 = vmatpush3.bf16.msra.mxu0 %v1654_v7  ;;  %v78_v7 = vld [vmem:[#allocation7 + $0x138] sm:$0xff] }
 0x669   :  { %1743 = vpow2.f32 %v741_v20 }
 0x66a   :  { %1745 = vrcp.f32 %v351_v21 }
 0x66c   :  { %v354_v23 = vpop.xlane.xlu0 %353 }
 0x66d   :  { %1747 = vrcp.f32 %v354_v23 }
 0x66f   :  { %v1742_v24 = vpop.eup %1741 }
 0x670   :  { %v743_v25 = vsel %vm336_vm9, %v1742_v24, 0.0 }
 0x671   :  { %744 = vadd.xlane.f32.xlu0 %v743_v25 }
 0x673   :  { %v1744_v27 = vpop.eup %1743 }
 0x674   :  { %v1746_v28 = vpop.eup %1745  ;;  %v746_v30 = vsel %vm336_vm9, %v1744_v27, 0.0 }
 0x675   :  { %747 = vadd.xlane.f32.xlu1 %v746_v30  ;;  %v357_v31 = vmul.f32 %v1746_v28, %v1738_v10 }
 0x677   :  { %v1748_v32 = vpop.eup %1747  ;;  %1506 = vmatprep.mubr.msk.f32.mxu1 %vm336_vm9, %v357_v31 }
 0x678   :  { %v358_v33 = vmul.f32 %v1748_v32, %v1740_v12  ;;  %v1037_v12 = vsub.s32 5, %v1952_v26  ;;  %v65_v32 = vld [vmem:[#allocation7 + $0x10] sm:$0xff] }
 0x67a   :  { %1507 = vmatmul.mubr.msk.f32.vlgmr.msra.gmra.mrb[0].mxu1 %vm336_vm9, %v358_v33  ;;  %v1038_v14 = vrot.slane %v1955_v29, %v1037_v12  ;;  %v66_v33 = vld [vmem:[#allocation7 + $0x30] sm:$0xff]  ;;  %v81_v12 = vld [vmem:[#allocation7 + $0x198] sm:$0xff] }
 0x67b   :  { %1637 = vmatpush3.bf16.msk.msra.mxu1 %vm2061_vm15, %v2056_v46 }
 0x67c   :  { %1640 = vmatprep.subr.msk.bf16.mxu1 %vm1984_vm4, %v2005_v5 }
 0x6fe   :  { %v745_v34 = vpop.xlane.xlu0 %744 }
 0x6ff   :  { %1749 = vrcp.f32 %v745_v34  ;;  %v1658_v34 = vpack.c.bf16 %v66_v33, %v65_v32 }
 0x701   :  { %1659 = vmatprep.subr.bf16.mxu0 %v1658_v34 }
 0x702   :  { %v748_v35 = vpop.xlane.xlu1 %747 }
 0x703   :  { %1751 = vrcp.f32 %v748_v35  ;;  %v67_v35 = vld [vmem:[#allocation7 + $0x50] sm:$0xff] }
 0x709   :  { %v1750_v36 = vpop.eup %1749 }
 0x70a   :  { %v751_v37 = vmul.f32 %v1750_v36, %v1742_v24  ;;  %v68_v36 = vld [vmem:[#allocation7 + $0x70] sm:$0xff] }
 0x70c   :  { %1520 = vmatprep.mubr.msk.f32.mxu1 %vm336_vm9, %v751_v37  ;;  %v1662_v37 = vpack.c.bf16 %v68_v36, %v67_v35 }
 0x70d   :  { %v1752_v38 = vpop.eup %1751 }
 0x70e   :  { %v752_v39 = vmul.f32 %v1752_v38, %v1744_v27  ;;  %v69_v38 = vld [vmem:[#allocation7 + $0x18] sm:$0xff] }
 0x710   :  { %1521 = vmatmul.mubr.msk.f32.vlgmr.msra.gmra.mrb[0].mxu1 %vm336_vm9, %v752_v39  ;;  %v70_v39 = vld [vmem:[#allocation7 + $0x38] sm:$0xff] }
 0x711   :  { %1643 = vmatpush3.bf16.xpose.msk.msra.mxu1 %vm1984_vm4, %v2005_v5  ;;  %1527 = vmatprep.mubr.msk.f32.mxu1 %vm85_vm0, %v837_v40  ;;  %v1666_v40 = vpack.c.bf16 %v70_v39, %v69_v38 }
 0x712   :  { %1646 = vmatprep.subr.msk.bf16.mxu1 %vm1645_vm1, %v2056_v46 }
 0x718   :  { %1528 = vmatmul.mubr.msk.f32.vlgmr.msra.gmra.mrb[2].mxu1 %vm85_vm0, %v838_v41 }
 0x719   :  { %1649 = vmatpush3.bf16.msk.msra.mxu1 %vm1645_vm1, %v2056_v46 }
 0x71a   :  { %1667 = vmatprep.subr.bf16.mxu1 %v1666_v40 }
 0x7eb   :  { %v1529_v42 = vpop.f32.mrb[2].mxu1 }
 0x7ec   :  { %v927_v43 = vadd.f32 %v1529_v42, %v2040_v22  ;;  %v921_v49 = vpop.f32.mrb[3].mxu1 }
 0x7ed   :  { %v922_v45 = vadd.f32 %v921_v49, %v2031_v13 }
 0x7ee   :  { %v933_v57 = vsel %vm336_vm9, %v927_v43, -inf }
 0x7ef   :  { %934 = vmax.xlane.f32.xlu1 %v933_v57  ;;  %v930_v5 = vsel %vm336_vm9, %v922_v45, -inf }
 0x7f0   :  { %931 = vmax.xlane.f32.xlu0 %v930_v5  ;;  %v1150_v5 = vsub.s32 2, %v1952_v26 }
 0x87c   :  { %v935_v47 = vpop.xlane.xlu1 %934 }
 0x87d   :  { %v937_v48 = vsub.f32 %v927_v43, %v935_v47  ;;  %v932_v44 = vpop.xlane.xlu0 %931  ;;  %v1156_v47 = vsub.s32 3, %v1952_v26 }
 0x87e   :  { %v936_v6 = vsub.f32 %v922_v45, %v932_v44 }
 0x87f   :  { %v940_v50 = vmul.f32 1.442695, %v937_v48  ;;  %v1151_v48 = vrot.slane %v1955_v29, %v1150_v5 }
 0x880   :  { %v938_v51 = vmul.f32 1.442695, %v936_v6 }
 0x881   :  { %1753 = vpow2.f32 %v940_v50 }
 0x882   :  { %1755 = vpow2.f32 %v938_v51 }
 0x88b   :  { %v1754_v46 = vpop.eup %1753 }
 0x88c   :  { %v1756_v52 = vpop.eup %1755  ;;  %v945_v22 = vsel %vm336_vm9, %v1754_v46, 0.0 }
 0x88d   :  { %946 = vadd.xlane.f32.xlu1 %v945_v22  ;;  %v942_v13 = vsel %vm336_vm9, %v1756_v52, 0.0 }
 0x88e   :  { %943 = vadd.xlane.f32.xlu0 %v942_v13 }
 0x91a   :  { %v947_v59 = vpop.xlane.xlu1 %946 }
 0x91b   :  { %1757 = vrcp.f32 %v947_v59  ;;  %v944_v60 = vpop.xlane.xlu0 %943  ;;  %v1670_v59 = vpack.c.bf16 %v72_v55, %v71_v54 }
 0x91c   :  { %1759 = vrcp.f32 %v944_v60  ;;  %v73_v60 = vld [vmem:[#allocation7 + $0x98] sm:$0xff] }
 0x925   :  { %v1758_v61 = vpop.eup %1757 }
 0x926   :  { %v1760_v62 = vpop.eup %1759  ;;  %v951_v3 = vmul.f32 %v1758_v61, %v1754_v46  ;;  %v1157_v46 = vrot.slane %v1955_v29, %v1156_v47  ;;  %v74_v61 = vld [vmem:[#allocation7 + $0xb8] sm:$0xff] }
 0x927   :  { %v950_v2 = vmul.f32 %v1760_v62, %v1756_v52  ;;  %v1674_v62 = vpack.c.bf16 %v74_v61, %v73_v60 }
 0x929   :  { %1534 = vmatprep.mubr.msk.f32.mxu1 %vm336_vm9, %v950_v2  ;;  %v75_v2 = vld [vmem:[#allocation7 + $0xd8] sm:$0xff] }
 0x92a   :  { %1535 = vmatmul.mubr.msk.f32.vlgmr.msra.gmra.mrb[0].mxu1 %vm336_vm9, %v951_v3  ;;  %v76_v3 = vld [vmem:[#allocation7 + $0xf8] sm:$0xff] }
 0x92b   :  { %1669 = vmatpush3.bf16.msra.mxu1 %v1666_v40  ;;  %v1678_v63 = vpack.c.bf16 %v76_v3, %v75_v2 }
 0x92c   :  { %1671 = vmatprep.subr.bf16.mxu1 %v1670_v59 }
 0x92f   :  { %1673 = vmatpush3.bf16.msra.mxu1 %v1670_v59 }
 0x930   :  { %1675 = vmatprep.subr.bf16.mxu1 %v1674_v62 }
 0x933   :  { %1677 = vmatpush3.bf16.msra.mxu1 %v1674_v62 }
 0x934   :  { %1679 = vmatprep.subr.bf16.mxu1 %v1678_v63 }
 0x937   :  { %1681 = vmatpush3.bf16.msra.mxu1 %v1678_v63 }
 0x9fd   :  { %v1536_v8 = vpop.f32.mrb[0].mxu1 }
 0x9fe   :  { %v1698_v9 = vadd.f32 %v1536_v8, %v2088_v56  ;;  %v1024_v10 = vpop.f32.mrb[1].mxu1  ;;  %v1682_v8 = vpack.c.bf16 %v78_v7, %v77_v4 }
 0x9ff   :  { %v1699_v11 = vadd.f32 %v1024_v10, %v2090_v58  ;;  %v80_v10 = vld [vmem:[#allocation7 + $0x178] sm:$0xff] }
 0xa00   :  { %1683 = vmatprep.subr.bf16.mxu1 %v1682_v8 }
 0xa01   :  { %1545 = vmatprep.mubr.msk.f32.mxu0 %vm85_vm0, %v1699_v11  ;;  %1685 = vmatpush3.bf16.msra.mxu1 %v1682_v8 }
 0xa02   :  { %1546 = vmatmul.mubr.msk.f32.vlgmr.msra.gmra.mrb[10].mxu0 %vm85_vm0, %v1698_v9  ;;  %v79_v9 = vld [vmem:[#allocation7 + $0x158] sm:$0xff] }
 0xa03   :  { %1661 = vmatpush3.bf16.msra.mxu0 %v1658_v34  ;;  %v1686_v11 = vpack.c.bf16 %v80_v10, %v79_v9 }
 0xa04   :  { %1663 = vmatprep.subr.bf16.mxu0 %v1662_v37 }
 0xa05   :  { %1687 = vmatprep.subr.bf16.mxu1 %v1686_v11 }
 0xa06   :  { %1689 = vmatpush3.bf16.msra.mxu1 %v1686_v11 }
 0xa07   :  { %1665 = vmatpush3.bf16.msra.mxu0 %v1662_v37 }
 0xad5   :  { %v1547_v15 = vpop.f32.mrb[10].mxu0 }
 0xad6   :  { %v1117_v16 = vadd.f32 %v1547_v15, %v1038_v14  ;;  %v1111_v17 = vpop.f32.mrb[11].mxu0 }
 0xad7   :  { %v1112_v18 = vadd.f32 %v1111_v17, %v1038_v14  ;;  %v82_v14 = vld [vmem:[#allocation7 + $0x1b8] sm:$0xff] }
 0xad8   :  { %v2142_v19 = vadd.f32 %v1117_v16, %v1942_v1  ;;  %v1690_v15 = vpack.c.bf16 %v82_v14, %v81_v12  ;;  %v83_v16 = vld [vmem:[#allocation7 + $0x1d8] sm:$0xff] }
 0xad9   :  { %v2145_v56 = vadd.f32 %v1112_v18, %v1940_v0  ;;  %v84_v17 = vld [vmem:[#allocation7 + $0x1f8] sm:$0xff] }
 0xada   :  { %v1125_v58 = vsel %vm85_vm0, %v2142_v19, 0.0  ;;  %1691 = vmatprep.subr.bf16.mxu1 %v1690_v15  ;;  %v1694_v18 = vpack.c.bf16 %v84_v17, %v83_v16 }
 0xadb   :  { %1126 = vadd.xlane.f32.xlu1 %v1125_v58  ;;  %v1122_v20 = vsel %vm85_vm0, %v2145_v56, 0.0  ;;  %1693 = vmatpush3.bf16.msra.mxu1 %v1690_v15  ;;  %v1162_v58 = vsub.s32 6, %v1952_v26 }
 0xadc   :  { %1123 = vadd.xlane.f32.xlu0 %v1122_v20  ;;  %1695 = vmatprep.subr.bf16.mxu1 %v1694_v18 }
 0xadd   :  { %v1163_v20 = vrot.slane %v1955_v29, %v1162_v58 }
 0xadf   :  { %1697 = vmatpush3.bf16.msra.mxu1 %v1694_v18 }
 0xb68   :  { %v1127_v21 = vpop.xlane.xlu1 %1126 }
 0xb69   :  { %v1129_v23 = vmul.f32 0.03125, %v1127_v21  ;;  %v1124_v24 = vpop.xlane.xlu0 %1123 }
 0xb6a   :  { %v1128_v25 = vmul.f32 0.03125, %v1124_v24 }
 0xb6b   :  { %v1131_v27 = vsub.f32 %v2142_v19, %v1129_v23 }
 0xb6c   :  { %v1130_v1 = vsub.f32 %v2145_v56, %v1128_v25 }
 0xb6d   :  { %v1133_v28 = vmul.f32 %v1131_v27, %v1131_v27 }
 0xb6e   :  { %v1132_v30 = vmul.f32 %v1130_v1, %v1130_v1 }
 0xb6f   :  { %v1137_v0 = vsel %vm85_vm0, %v1133_v28, 0.0 }
 0xb70   :  { %1138 = vadd.xlane.f32.xlu1 %v1137_v0  ;;  %v1134_v31 = vsel %vm85_vm0, %v1132_v30, 0.0 }
 0xb71   :  { %1135 = vadd.xlane.f32.xlu0 %v1134_v31 }
 0xbfd   :  { %v1139_v41 = vpop.xlane.xlu1 %1138 }
 0xbfe   :  { %v1141_v42 = vmul.f32 0.03125, %v1139_v41  ;;  %v1136_v43 = vpop.xlane.xlu0 %1135 }
 0xbff   :  { %v1140_v49 = vmul.f32 0.03125, %v1136_v43 }
 0xc00   :  { %v1143_v45 = vadd.f32 1e-05, %v1141_v42 }
 0xc01   :  { %v1142_v57 = vadd.f32 1e-05, %v1140_v49  ;;  %v1265_v49 = vsub.s32 7, %v1952_v26 }
 0xc02   :  { %1761 = vrsqrt.f32 %v1143_v45 }
 0xc03   :  { %1763 = vrsqrt.f32 %v1142_v57  ;;  %v1266_v45 = vrot.slane %v1955_v29, %v1265_v49 }
 0xc0c   :  { %v1762_v44 = vpop.eup %1761 }
 0xc0d   :  { %v1764_v6 = vpop.eup %1763  ;;  %v1147_v50 = vmul.f32 %v1762_v44, %v1131_v27 }
 0xc0e   :  { %v1146_v51 = vmul.f32 %v1764_v6, %v1130_v1 }
 0xc0f   :  { %v1153_v52 = vmul.f32 %v1151_v48, %v1147_v50 }
 0xc10   :  { %v1152_v22 = vmul.f32 %v1151_v48, %v1146_v51 }
 0xc11   :  { %v1159_v53 = vadd.f32 %v1157_v46, %v1153_v52 }
 0xc12   :  { %v1158_v13 = vadd.f32 %v1157_v46, %v1152_v22 }
 0xc14   :  { %1556 = vmatprep.mubr.msk.f32.mxu0 %vm85_vm0, %v1158_v13 }
 0xc15   :  { %1557 = vmatmul.mubr.msk.f32.vlgmr.msra.gmra.mrb[12].mxu0 %vm85_vm0, %v1159_v53 }
 0xce8   :  { %v1558_v21 = vpop.f32.mrb[12].mxu0 }
 0xce9   :  { %v1242_v23 = vadd.f32 %v1558_v21, %v1163_v20  ;;  %v1236_v24 = vpop.f32.mrb[13].mxu0 }
 0xcea   :  { %v1237_v25 = vadd.f32 %v1236_v24, %v1163_v20 }
 0xceb   :  { %v1248_v27 = vmul.f32 %v1242_v23, %v1242_v23  ;;  %v1246_v41 = vmul.f32 0.5, %v1242_v23 }
 0xcec   :  { %v1247_v1 = vmul.f32 %v1237_v25, %v1237_v25  ;;  %v1245_v39 = vmul.f32 0.5, %v1237_v25 }
 0xced   :  { %v1250_v28 = vmul.f32 %v1248_v27, %v1242_v23 }
 0xcee   :  { %v1249_v30 = vmul.f32 %v1247_v1, %v1237_v25 }
 0xcef   :  { %v1252_v0 = vmul.f32 0.044715, %v1250_v28 }
 0xcf0   :  { %v1251_v31 = vmul.f32 0.044715, %v1249_v30 }
 0xcf1   :  { %v1254_v32 = vadd.f32 %v1252_v0, %v1242_v23 }
 0xcf2   :  { %v1253_v33 = vadd.f32 %v1251_v31, %v1237_v25 }
 0xcf3   :  { %v1256_v34 = vmul.f32 0.7978845, %v1254_v32 }
 0xcf4   :  { %v1255_v35 = vmul.f32 0.7978845, %v1253_v33 }
 0xcf5   :  { %1765 = vtanh.f32 %v1256_v34 }
 0xcf6   :  { %1767 = vtanh.f32 %v1255_v35 }
 0xcff   :  { %v1766_v36 = vpop.eup %1765 }
 0xd00   :  { %v1768_v37 = vpop.eup %1767  ;;  %v1260_v38 = vadd.f32 1.0, %v1766_v36 }
 0xd01   :  { %v1259_v40 = vadd.f32 1.0, %v1768_v37 }
 0xd02   :  { %v1262_v43 = vmul.f32 %v1260_v38, %v1246_v41 }
 0xd03   :  { %v1261_v42 = vmul.f32 %v1259_v40, %v1245_v39 }
 0xd05   :  { %1591 = vmatprep.mubr.f32.mxu1 %v1261_v42 }
 0xd06   :  { %1592 = vmatmul.mubr.f32.vlgmr.msra.gmra.mrb[4].mxu1 %v1262_v43 }
 0xdd9   :  { %v1593_v57 = vpop.f32.mrb[4].mxu1 }
 0xdda   :  { %v1339_v5 = vadd.f32 %v1593_v57, %v1266_v45  ;;  %v1333_v47 = vpop.f32.mrb[5].mxu1 }
 0xddb   :  { %v1334_v48 = vadd.f32 %v1333_v47, %v1266_v45 }
 0xddc   :  { %v1343_v44 = vadd.f32 %v1339_v5, %v2142_v19 }
 0xddd   :  { %v1342_v6 = vadd.f32 %v1334_v48, %v2145_v56 }
 0xdde   :  { %1345 = vst.msk [vmem:[#allocation8 + $0x8] sm:$0xff] %vm85_vm0, %v1343_v44 }
 0xddf   :  { %1344 = vst.msk [vmem:[#allocation8] sm:$0xff] %vm85_vm0, %v1342_v6 }
 0xde0   :  { %1846 = shalt.err (!%p1843_p0)
}
 0xde1   :  { %s1847_s29 = scalar_lea.hbm %s2187_s3, 256 }
 0xde2   :  { %p1848_p1 = scmp.ne.s32.totalorder %s2187_s3, %s1847_s29  ;;  %p1851_p2 = scmp.lt.u32.totalorder %s1847_s29, %s2187_s3 }
 0xde4   :  { %p1853_p3 = pnand %p1851_p2, %p1848_p1 }
 0xde6   :  { %1856 = shalt.err (!%p1853_p3)
}
 0xde7   :  { %1357 = dma.vmem_to_hbm [thread:$0]  %s1352_s25, 256, %s2187_s3, [#allocation4], %s1865_s1, %s1865_s1, %s1866_s7  }
 0xde8   :  { %1861 = dma.done.wait [#allocation4], 256  }
 0xde9   :  { %1862 = vsyncadd [#allocation4], 4294967040 }
 0xdea   :  { %1361 = vsyncpa [#allocation3], 1 }
 0xdeb   :  { %1362 = vsyncpa [#allocation6], 1 }
 0xdec   :  { %1363 = vsyncpa [#allocation4], 1 }

</bundles_post_ra>
